<compile_context>
chip_gen: v7x
topology: tpu7x:2x2x1
jax: 0.10.0
libtpu: 0.0.40
codegen_flags: <defaults>
</compile_context>

<pallas_src>
import jax
import jax.numpy as jnp
from jax.experimental import pallas as pl
from jax.experimental.pallas import tpu as pltpu


def _round_up(a, m):
    return (a + m - 1) // m * m


def _pick_tile(dim_pad, target):
    """Largest multiple-of-128 divisor of dim_pad that is <= target."""
    best = 128
    d = 128
    while d <= min(dim_pad, target):
        if dim_pad % d == 0:
            best = d
        d += 128
    return best


# ---------------------------------------------------------------------------
# Kernels
# ---------------------------------------------------------------------------

def _fused_linear_small_kernel(x_ref, w_ref, b_ref, o_ref):
    """Whole-problem single block: o = x @ w + b (w already [K, N])."""
    o_ref[...] = (
        jnp.dot(x_ref[...], w_ref[...], preferred_element_type=jnp.float32)
        + b_ref[...]
    ).astype(o_ref.dtype)


def _fused_linear_tiled_kernel(x_ref, w_ref, b_ref, o_ref):
    """Tiled fused linear.

    x_ref: [tm, tk] activation tile (compute dtype)
    w_ref: [tk, tn] pre-transposed weight tile (compute dtype)
    b_ref: [1,  tn] f32 bias tile
    o_ref: [tm, tn] f32 output tile — doubles as the accumulator (same block
           index across the K axis), bias folded into the k==0 init.
    """
    @pl.when(pl.program_id(2) == 0)
    def _():
        o_ref[...] = jnp.broadcast_to(b_ref[...], o_ref.shape)

    o_ref[...] += jnp.dot(x_ref[...], w_ref[...],
                          preferred_element_type=jnp.float32)


# ---------------------------------------------------------------------------
# Parameter preparation (hoisted out of the per-call path)
# ---------------------------------------------------------------------------

def prepare_multihead_params(w1, b1, w2, b2, compute_dtype=jnp.float32):
    """Fuse the two heads ONCE (do this at init, not per forward).

    Returns:
      w_fused: [K_pad, N_pad] — concat of both weights, transposed to [in, out]
               (native MXU [M,K]x[K,N] stream), padded to 128-multiples, cast
               to compute_dtype (bf16 halves the weight HBM stream).
      b_fused: [1, N_pad] f32 — concat bias (f32 for the f32 accumulate).
      head_dims: (out_1, out_2) for slicing the fused output.
    """
    out_1, in_1 = w1.shape
    out_2 = w2.shape[0]
    n = out_1 + out_2
    n_pad = _round_up(n, 128)        # lane-dense output -> unmasked vst
    k_pad = _round_up(in_1, 128)

    w = jnp.concatenate([w1, w2], axis=0).T                     # [K, N]
    w = jnp.pad(w, ((0, k_pad - in_1), (0, n_pad - n))).astype(compute_dtype)

    b = jnp.concatenate([b1, b2]).astype(jnp.float32).reshape(1, n)
    b = jnp.pad(b, ((0, 0), (0, n_pad - n)))
    return w, b, (out_1, out_2)


# ---------------------------------------------------------------------------
# Tile plan
# ---------------------------------------------------------------------------

_VMEM_WORKING_SET_BUDGET = 20 * 1024 * 1024   # fits v7x (64 MiB) with headroom
_VMEM_LIMIT_BYTES = 48 * 1024 * 1024          # explicit scoped-VMEM raise


def _tile_plan(b_rows, k_pad, n_pad, in_itemsize):
    tm = min(128, _round_up(b_rows, 8))
    b_pad = _round_up(b_rows, tm)

    tn_target = 512 if in_itemsize >= 4 else 1024
    # v7x megacore: single batch tile -> keep >= 2 blocks on the j axis.
    if b_pad // tm == 1 and n_pad >= 256:
        tn_target = min(tn_target, max(128, (n_pad // 2) // 128 * 128))
    tn = _pick_tile(n_pad, tn_target)

    def working_set(tk):
        # double-buffered inputs + f32 output/accumulator (x2 for pipelining)
        return 2 * (tm * tk + tk * tn) * in_itemsize + 2 * tm * tn * 4

    # Prefer keeping the whole K dim resident (no K grid axis): x is fetched
    # once per batch tile and there is no per-(i,j) re-accumulation traffic.
    if working_set(k_pad) <= _VMEM_WORKING_SET_BUDGET:
        tk = k_pad
    else:
        tk_target = 1024 if in_itemsize >= 4 else 2048
        tk = _pick_tile(k_pad, tk_target)
        while tk > 128 and working_set(tk) > _VMEM_WORKING_SET_BUDGET:
            tk = _pick_tile(k_pad, tk - 128)
    return tm, tn, tk, b_pad


# ---------------------------------------------------------------------------
# Forward wrapper
# ---------------------------------------------------------------------------

def multihead_linear(x, w_fused, b_fused, head_dims):
    """Fused MultiHeadLinear forward: (x @ W1.T + b1, x @ W2.T + b2).

    x: [B, in_1]; w_fused/b_fused/head_dims come from prepare_multihead_params.
    """
    out_1, out_2 = head_dims
    b_rows, k = x.shape
    k_pad, n_pad = w_fused.shape
    compute_dtype = w_fused.dtype
    in_itemsize = jnp.dtype(compute_dtype).itemsize
    out_dtype = jnp.float32                       # f32 accumulate / f32 output

    # ---- small-shape fast path: single whole-array VMEM block, no grid ----
    if b_rows <= 256 and k_pad <= 512 and n_pad <= 1024:
        bm = _round_up(b_rows, 8)
        x_p = x.astype(compute_dtype)
        if (bm, k_pad) != (b_rows, k):
            x_p = jnp.pad(x_p, ((0, bm - b_rows), (0, k_pad - k)))
        y = pl.pallas_call(
            _fused_linear_small_kernel,
            out_shape=jax.ShapeDtypeStruct((bm, n_pad), out_dtype),
            in_specs=[pl.BlockSpec(memory_space=pltpu.MemorySpace.VMEM)] * 3,
            out_specs=pl.BlockSpec(memory_space=pltpu.MemorySpace.VMEM),
        )(x_p, w_fused, b_fused)
    else:
        # ---- tiled path ----
        tm, tn, tk, b_pad = _tile_plan(b_rows, k_pad, n_pad, in_itemsize)
        x_p = x.astype(compute_dtype)
        if (b_pad, k_pad) != (b_rows, k):
            x_p = jnp.pad(x_p, ((0, b_pad - b_rows), (0, k_pad - k)))
        grid = (b_pad // tm, n_pad // tn, k_pad // tk)

        cost = pl.CostEstimate(
            flops=2 * b_pad * n_pad * k_pad,
            transcendentals=0,
            bytes_accessed=(x_p.size + w_fused.size) * in_itemsize
                           + (b_fused.size + b_pad * n_pad) * 4,
        )

        y = pl.pallas_call(
            _fused_linear_tiled_kernel,
            out_shape=jax.ShapeDtypeStruct((b_pad, n_pad), out_dtype),
            grid=grid,
            in_specs=[
                pl.BlockSpec((tm, tk), lambda i, j, kk: (i, kk)),   # x
                pl.BlockSpec((tk, tn), lambda i, j, kk: (kk, j)),   # weight [K,N]
                pl.BlockSpec((1, tn), lambda i, j, kk: (0, j)),     # bias
            ],
            out_specs=pl.BlockSpec((tm, tn), lambda i, j, kk: (i, j)),
            compiler_params=pltpu.CompilerParams(
                dimension_semantics=("parallel", "parallel", "arbitrary"),
                vmem_limit_bytes=_VMEM_LIMIT_BYTES,
            ),
            cost_estimate=cost,
        )(x_p, w_fused, b_fused)

    y1 = y[:b_rows, :out_1].astype(x.dtype)
    y2 = y[:b_rows, out_1:out_1 + out_2].astype(x.dtype)
    return y1, y2


def _init_linear_params(key, in_features, out_features, dtype=jnp.float32):
    """Deterministic init matching nn.Linear's default (uniform +-1/sqrt(in))."""
    kw, kb = jax.random.split(key)
    bound = 1.0 / (in_features ** 0.5)
    w = jax.random.uniform(kw, (out_features, in_features), dtype,
                           minval=-bound, maxval=bound)
    b = jax.random.uniform(kb, (out_features,), dtype,
                           minval=-bound, maxval=bound)
    return w, b


if __name__ == "__main__":
    # MultiHeadLinear(in_1=32, out_1=16, out_2=64), batch=8
    B, IN_1, OUT_1, OUT_2 = 8, 32, 16, 64

    key = jax.random.PRNGKey(0)
    kx, k1, k2 = jax.random.split(key, 3)
    x = jax.random.normal(kx, (B, IN_1), dtype=jnp.float32)
    w1, b1 = _init_linear_params(k1, IN_1, OUT_1)
    w2, b2 = _init_linear_params(k2, IN_1, OUT_2)

    ref1 = x @ w1.T + b1
    ref2 = x @ w2.T + b2

    # 1) f32 compute (small fast path) — tight check against the reference.
    wf, bf, heads = prepare_multihead_params(w1, b1, w2, b2, jnp.float32)
    y1, y2 = multihead_linear(x, wf, bf, heads)
    jax.block_until_ready((y1, y2))
    assert y1.shape == (B, OUT_1) and y2.shape == (B, OUT_2)
    assert jnp.allclose(y1, ref1, atol=1e-5, rtol=1e-5)
    assert jnp.allclose(y2, ref2, atol=1e-5, rtol=1e-5)

    # 2) bf16 weight/activation stream, f32 accumulate (looser tolerance).
    wf16, bf16, heads16 = prepare_multihead_params(w1, b1, w2, b2, jnp.bfloat16)
    z1, z2 = multihead_linear(x, wf16, bf16, heads16)
    jax.block_until_ready((z1, z2))
    assert jnp.allclose(z1, ref1, atol=5e-2, rtol=5e-2)
    assert jnp.allclose(z2, ref2, atol=5e-2, rtol=5e-2)

    # 3) Exercise the tiled (grid) path at a modest shape.
    Bt, Kt, O1t, O2t = 512, 1024, 384, 640
    kx2, k3, k4 = jax.random.split(jax.random.PRNGKey(0), 3)
    xt = jax.random.normal(kx2, (Bt, Kt), dtype=jnp.float32)
    w1t, b1t = _init_linear_params(k3, Kt, O1t)
    w2t, b2t = _init_linear_params(k4, Kt, O2t)
    wt, bt, headst = prepare_multihead_params(w1t, b1t, w2t, b2t, jnp.float32)
    t1, t2 = multihead_linear(xt, wt, bt, headst)
    jax.block_until_ready((t1, t2))
    rt1 = xt @ w1t.T + b1t
    rt2 = xt @ w2t.T + b2t
    assert t1.shape == (Bt, O1t) and t2.shape == (Bt, O2t)
    assert jnp.allclose(t1, rt1, atol=1e-3, rtol=1e-3)
    assert jnp.allclose(t2, rt2, atol=1e-3, rtol=1e-3)

    print("KERNEL_OK")
</pallas_src>

<mosaic_0001>
module attributes {stable_mosaic.version = 11 : i64} {
  func.func @_fused_linear_small_kernel(%arg0: memref<8x128xf32, #tpu.memory_space<vmem>>, %arg1: memref<128x128xf32, #tpu.memory_space<vmem>>, %arg2: memref<1x128xf32, #tpu.memory_space<vmem>>, %arg3: memref<8x128xf32, #tpu.memory_space<vmem>>) attributes {dimension_semantics = [], scalar_prefetch = 0 : i64, scratch_operands = 0 : i64, tpu.core_type = #tpu.core_type<tc>} {
    %c0 = arith.constant 0 : index
    %c0_0 = arith.constant 0 : index
    %0 = vector.load %arg0[%c0, %c0_0] : memref<8x128xf32, #tpu.memory_space<vmem>>, vector<8x128xf32>
    %c0_1 = arith.constant 0 : index
    %c0_2 = arith.constant 0 : index
    %1 = vector.load %arg1[%c0_1, %c0_2] : memref<128x128xf32, #tpu.memory_space<vmem>>, vector<128x128xf32>
    %cst = arith.constant dense<0.000000e+00> : vector<8x128xf32>
    %2 = tpu.matmul %0, %1, %cst {dimension_numbers = #tpu.dot_dimension_numbers<[1], [0], [0], [1], [0, 0, 1, 1], [], []>} : vector<8x128xf32>, vector<128x128xf32>, vector<8x128xf32> -> vector<8x128xf32>
    %c0_3 = arith.constant 0 : index
    %c0_4 = arith.constant 0 : index
    %3 = vector.load %arg2[%c0_3, %c0_4] : memref<1x128xf32, #tpu.memory_space<vmem>>, vector<1x128xf32>
    %4 = vector.broadcast %3 : vector<1x128xf32> to vector<8x128xf32>
    %5 = arith.addf %2, %4 : vector<8x128xf32>
    %c0_5 = arith.constant 0 : index
    %c0_6 = arith.constant 0 : index
    %6 = vector.load %arg3[%c0_5, %c0_6] : memref<8x128xf32, #tpu.memory_space<vmem>>, vector<8x128xf32>
    tpu.vector_store %arg3[%c0_5, %c0_6], %5 {strides = array<i32>} : memref<8x128xf32, #tpu.memory_space<vmem>>, vector<8x128xf32>,
    return
  }
}

</mosaic_0001>

<bundles_post_ra>
// kernel: tpu_custom_call.1
= control target key start
LH: loop header
LB: loop body
LE: loop exit
PB: predicated region body
PF: predicated region fallthrough
CT: control target
= control target key end

     0   :  { %8 = vsyncpa [#allocation3], 0  ;;  %s383_s0 = inlined_call_operand.hbm [shape: f32[8,128], index: 0, kind: input, shape index: {}]   ;;  %s384_s1 = inlined_call_operand.hbm [shape: f32[128,128], index: 1, kind: input, shape index: {}]   ;;  %s385_s2 = inlined_call_operand.vmem [shape: f32[1,128], index: 2, kind: input, shape index: {}]   ;;  %s386_s3 = inlined_call_operand.hbm [shape: f32[8,128], index: 3, kind: output, shape index: {}]  }
   0x1   :  { %9 = vsyncpa [#allocation6], 0 }
   0x2   :  { %10 = vsyncpa [#allocation4], 0  ;;  %s309_s12 = smov [#allocation2]   ;;  %s310_s14 = smov [#allocation5]  }
   0x3   :  { %s17_s13 = sshll.u32 %s309_s12, 4  ;;  %s26_s15 = sshll.u32 %s310_s14, 4  ;;  %s18_s13 = int_to_ptr.vmem [resolvable:$true] %s17_s13  ;;  %s337_s15 = int_to_ptr.vmem [resolvable:$true] %s26_s15 }
   0x4   :  { %s237_s18 = scalar_lea.hbm %s383_s0, 128 }
   0x5   :  { %p238_p0 = scmp.ne.s32.totalorder %s383_s0, %s237_s18  ;;  %p241_p1 = scmp.lt.u32.totalorder %s237_s18, %s383_s0 }
   0x7   :  { %p243_p2 = pnand %p241_p1, %p238_p0 }
   0x9   :  { %246 = shalt.err (!%p243_p2)
}
   0xa   :  { %s247_s23 = scalar_lea.vmem %s18_s13, 128  ;;  %p252_p4 = scmp.lt.s32.totalorder %s18_s13, %s18_s13 }
   0xb   :  { %p248_p3 = scmp.ne.s32.totalorder %s18_s13, %s247_s23  ;;  %p253_p5 = scmp.lt.s32.totalorder %s247_s23, %s247_s23 }
   0xd   :  { %p254_p6 = por %p253_p5, %p252_p4 }
   0xf   :  { %p255_p7 = pnand %p254_p6, %p248_p3 }
  0x11   :  { %258 = shalt.err (!%p255_p7)
}
  0x12   :  { %20 = dma.hbm_to_vmem [thread:$0]  %s383_s0, 128, %s18_s13, [#allocation3]  }
  0x13   :  { %s259_s28 = scalar_lea.hbm %s384_s1, 2048 }
  0x14   :  { %p260_p8 = scmp.ne.s32.totalorder %s384_s1, %s259_s28  ;;  %p263_p9 = scmp.lt.u32.totalorder %s259_s28, %s384_s1 }
  0x16   :  { %p265_p10 = pnand %p263_p9, %p260_p8 }
  0x18   :  { %268 = shalt.err (!%p265_p10)
}
  0x19   :  { %s269_s6 = scalar_lea.vmem %s337_s15, 2048  ;;  %p274_p12 = scmp.lt.s32.totalorder %s337_s15, %s337_s15 }
  0x1a   :  { %p270_p11 = scmp.ne.s32.totalorder %s337_s15, %s269_s6  ;;  %p275_p13 = scmp.lt.s32.totalorder %s269_s6, %s269_s6 }
  0x1c   :  { %p276_p0 = por %p275_p13, %p274_p12 }
  0x1e   :  { %p277_p1 = pnand %p276_p0, %p270_p11 }
  0x20   :  { %280 = shalt.err (!%p277_p1)
}
  0x21   :  { %s311_s0 = smov 128   ;;  %s312_s7 = smov 8  }
  0x22   :  { %32 = dma.hbm_to_vmem [thread:$0]  %s384_s1, 2048, %s337_s15, [#allocation6], %s311_s0, %s311_s0, %s312_s7  }
  0x23   :  { %303 = dma.done.wait [#allocation3], 128  }
  0x24   :  { %304 = vsyncadd [#allocation3], 4294967168 }
  0x25   :  { %305 = dma.done.wait [#allocation6], 2048  }
  0x26   :  { %306 = vsyncadd [#allocation6], 4294965248  ;;  %v313_v0 = vmov 0.0|0.0   ;;  %vm314_vm0 = vmmov 0   ;;  %v315_v1 = vmov 0.0   ;;  %v42_v2 = vld [vmem:[#allocation5] sm:$0xff] }
  0x27   :  { %205 = vmatprep.subr.bf16.mxu0 %v313_v0  ;;  %202 = vmatprep.mubr.msk.f32.mxu0 %vm314_vm0, %v315_v1  ;;  %v43_v3 = vld [vmem:[#allocation5 + $0x8] sm:$0xff]  ;;  %v44_v4 = vld [vmem:[#allocation5 + $0x10] sm:$0xff]  ;;  %v45_v6 = vld [vmem:[#allocation5 + $0x18] sm:$0xff]  ;;  %s316_s11 = smov [#allocation7]  }
  0x28   :  { %v206_v5 = vpack.c.bf16 %v43_v3, %v42_v2  ;;  %v209_v7 = vpack.c.bf16 %v45_v6, %v44_v4  ;;  %v46_v8 = vld [vmem:[#allocation5 + $0x20] sm:$0xff]  ;;  %v47_v9 = vld [vmem:[#allocation5 + $0x28] sm:$0xff]  ;;  %v48_v11 = vld [vmem:[#allocation5 + $0x30] sm:$0xff]  ;;  %s142_s12 = sshll.u32 %s316_s11, 4  ;;  %s143_s12 = int_to_ptr.vmem [resolvable:$true] %s142_s12 }
  0x29   :  { %v212_v10 = vpack.c.bf16 %v47_v9, %v46_v8  ;;  %v49_v12 = vld [vmem:[#allocation5 + $0x38] sm:$0xff]  ;;  %v50_v14 = vld [vmem:[#allocation5 + $0x40] sm:$0xff]  ;;  %v51_v15 = vld [vmem:[#allocation5 + $0x48] sm:$0xff]  ;;  %s281_s13 = scalar_lea.vmem %s143_s12, 128  ;;  %p286_p3 = scmp.lt.s32.totalorder %s143_s12, %s143_s12 }
  0x2a   :  { %207 = vmatpush3.bf16.msra.mxu0 %v206_v5  ;;  %v215_v13 = vpack.c.bf16 %v49_v12, %v48_v11  ;;  %v218_v16 = vpack.c.bf16 %v51_v15, %v50_v14  ;;  %v52_v17 = vld [vmem:[#allocation5 + $0x50] sm:$0xff]  ;;  %v53_v18 = vld [vmem:[#allocation5 + $0x58] sm:$0xff]  ;;  %v54_v20 = vld [vmem:[#allocation5 + $0x60] sm:$0xff]  ;;  %p282_p2 = scmp.ne.s32.totalorder %s143_s12, %s281_s13  ;;  %p287_p4 = scmp.lt.s32.totalorder %s281_s13, %s281_s13 }
  0x2b   :  { %208 = vmatprep.subr.bf16.mxu0 %v313_v0  ;;  %v221_v19 = vpack.c.bf16 %v53_v18, %v52_v17  ;;  %v55_v21 = vld [vmem:[#allocation5 + $0x68] sm:$0xff]  ;;  %v56_v23 = vld [vmem:[#allocation5 + $0x70] sm:$0xff]  ;;  %v57_v24 = vld [vmem:[#allocation5 + $0x78] sm:$0xff] }
  0x2c   :  { %v224_v22 = vpack.c.bf16 %v55_v21, %v54_v20  ;;  %v227_v25 = vpack.c.bf16 %v57_v24, %v56_v23  ;;  %v41_v26 = vld [vmem:[#allocation2] sm:$0xff]  ;;  %p288_p5 = por %p287_p4, %p286_p3 }
  0x2d   :  { %v152_v27 = vld [vmem:[%s385_s2] ss:$0 sm:$0xff] }
  0x2e   :  { %210 = vmatpush3.bf16.msra.mxu0 %v209_v7  ;;  %p289_p6 = pnand %p288_p5, %p282_p2 }
  0x2f   :  { %211 = vmatprep.subr.bf16.mxu0 %v313_v0 }
  0x32   :  { %213 = vmatpush3.bf16.msra.mxu0 %v212_v10 }
  0x33   :  { %214 = vmatprep.subr.bf16.mxu0 %v313_v0 }
  0x36   :  { %216 = vmatpush3.bf16.msra.mxu0 %v215_v13 }
  0x37   :  { %217 = vmatprep.subr.bf16.mxu0 %v313_v0 }
  0x3a   :  { %219 = vmatpush3.bf16.msra.mxu0 %v218_v16 }
  0x3b   :  { %220 = vmatprep.subr.bf16.mxu0 %v313_v0 }
  0x3e   :  { %222 = vmatpush3.bf16.msra.mxu0 %v221_v19 }
  0x3f   :  { %223 = vmatprep.subr.bf16.mxu0 %v313_v0 }
  0x42   :  { %225 = vmatpush3.bf16.msra.mxu0 %v224_v22 }
  0x43   :  { %226 = vmatprep.subr.bf16.mxu0 %v313_v0 }
  0x46   :  { %228 = vmatpush3.bf16.msra.mxu0 %v227_v25 }
  0x49   :  { %203 = vmatmul.mubr.f32.vlgmr.msra.gmra.mrb[0].mxu0 %v41_v26 }
 0x11c   :  { %v131_v28 = vpop.f32.mrb[0].mxu0 }
 0x11d   :  { %v132_v29 = vadd.f32 %v152_v27, %v131_v28  ;;  %v204_v30 = vpop.f32.mrb[1].mxu0 }
 0x11f   :  { %135 = vst [vmem:[#allocation7] sm:$0xff] %v132_v29 }
 0x120   :  { %292 = shalt.err (!%p289_p6)
}
 0x121   :  { %s293_s16 = scalar_lea.hbm %s386_s3, 128 }
 0x122   :  { %p294_p7 = scmp.ne.s32.totalorder %s386_s3, %s293_s16  ;;  %p297_p8 = scmp.lt.u32.totalorder %s293_s16, %s386_s3 }
 0x124   :  { %p299_p9 = pnand %p297_p8, %p294_p7 }
 0x126   :  { %302 = shalt.err (!%p299_p9)
}
 0x127   :  { %145 = dma.vmem_to_hbm [thread:$0]  %s143_s12, 128, %s386_s3, [#allocation4]  }
 0x128   :  { %307 = dma.done.wait [#allocation4], 128  }
 0x129   :  { %308 = vsyncadd [#allocation4], 4294967168 }
 0x12a   :  { %149 = vsyncpa [#allocation3], 1 }
 0x12b   :  { %150 = vsyncpa [#allocation6], 1 }
 0x12c   :  { %151 = vsyncpa [#allocation4], 1 }

</bundles_post_ra>
